<compile_context>
chip_gen: v5e
topology: v5e:2x2
jax: 0.10.0
libtpu: 0.0.40
codegen_flags: <defaults>
</compile_context>

<pallas_src>
import jax
import jax.numpy as jnp
from jax.experimental import pallas as pl
from jax.experimental.pallas import tpu as pltpu


def _round_up(x: int, m: int) -> int:
    return (x + m - 1) // m * m


def _vmem_capacity_bytes() -> int:
    """Physical VMEM per core; conservative 64 MiB fallback if query fails."""
    try:
        return int(pltpu.get_tpu_info().vmem_capacity_bytes)
    except Exception:  # pragma: no cover - query not available everywhere
        return 64 * 1024 * 1024


def _default_tiles(vmem_cap: int):
    """Returns (tm, tn, tk, vmem_limit_cap) sized for the chip's VMEM."""
    if vmem_cap >= 128 * 1024 * 1024:          # v5e / v6e (128 MiB VMEM)
        return 1536, 1536, 1024, 100 * 1024 * 1024
    # v7x-class: 64 MiB VMEM per TensorCore -> smaller tk, tighter cap.
    return 1536, 1536, 512, 56 * 1024 * 1024


def bn_linear_kernel(x_ref, w_ref, side_ref, o_ref, acc_ref):
    """One (tm, tn) output tile, reducing over the K grid axis.

    x_ref:    (tm, tk) bf16
    w_ref:    (tk, tn) bf16
    side_ref: (3, tn)  f32   rows = [linear bias, bn scale, bn shift]
    o_ref:    (tm, tn) out dtype
    acc_ref:  (tm, tn) f32 scratch accumulator (resident across the K axis)
    """
    k = pl.program_id(2)
    prod = jnp.dot(x_ref[...], w_ref[...], preferred_element_type=jnp.float32)

    @pl.when(k == 0)
    def _first():
        acc_ref[...] = prod            # no zero-init write + RMW on step 0

    @pl.when(k > 0)
    def _accumulate():
        acc_ref[...] += prod

    @pl.when(k == pl.num_programs(2) - 1)
    def _finalize():
        bias = side_ref[0:1, :]        # (1, tn) f32, broadcasts over rows
        scale = side_ref[1:2, :]
        shift = side_ref[2:3, :]
        y = acc_ref[...] + bias        # Linear bias (cannot fold: ReLU next)
        y = jnp.maximum(y, 0.0)        # ReLU
        y = y * scale + shift          # BatchNorm1d (eval mode, folded)
        o_ref[...] = y.astype(o_ref.dtype)   # Dropout (eval) = identity


def prepare_bn_linear(w_t, b, gamma, beta, running_mean, running_var,
                      eps: float = 1e-5, *, tn=None, tk=None, vmem_cap=None):
    """One-time weight/side-input preparation (hoisted out of the call path).

    w_t: (in_features, out_features) -- linear weight pre-transposed.
    """
    IN, OUT = w_t.shape
    if vmem_cap is None:
        vmem_cap = _vmem_capacity_bytes()
    d_tm, d_tn, d_tk, vmem_limit_cap = _default_tiles(vmem_cap)

    tn = d_tn if tn is None else tn
    tk = d_tk if tk is None else tk
    tn = min(tn, _round_up(OUT, 128))          # lane-dense output tiles
    tk = min(tk, _round_up(IN, 128))
    N, K = _round_up(OUT, tn), _round_up(IN, tk)

    # Fold BatchNorm1d (eval mode) into per-feature scale/shift.
    scale = gamma.astype(jnp.float32) * jax.lax.rsqrt(
        running_var.astype(jnp.float32) + eps)
    shift = beta.astype(jnp.float32) - running_mean.astype(jnp.float32) * scale

    # Pad + cast the weight ONCE (static for inference).
    w_bf = w_t.astype(jnp.bfloat16)
    if (K, N) == (IN, OUT):
        w_p = w_bf
    else:
        w_p = jnp.zeros((K, N), jnp.bfloat16).at[:IN, :OUT].set(w_bf)

    # Fused side input: rows = [bias, bn_scale, bn_shift], f32.
    side = jnp.zeros((3, N), jnp.float32)
    side = side.at[0, :OUT].set(b.astype(jnp.float32))
    side = side.at[1, :OUT].set(scale)
    side = side.at[2, :OUT].set(shift)

    return dict(w_p=w_p, side=side, tn=tn, tk=tk, N=N, K=K, IN=IN, OUT=OUT,
                d_tm=d_tm, vmem_limit_cap=vmem_limit_cap,
                bias=b.astype(jnp.float32), scale=scale, shift=shift)


def bn_linear_apply(params, x, *, tm=None, force_pallas=False):
    """x: (B, in_features) -> (B, out_features)."""
    B, IN = x.shape
    assert IN == params["IN"], "in_features mismatch"
    OUT = params["OUT"]
    out_dtype = x.dtype

    # Tiny-problem bypass: pad/cast + launch overhead dominates; let XLA fuse.
    if (not force_pallas) and (2 * B * IN * OUT < (1 << 21)):
        y = jnp.dot(x.astype(jnp.bfloat16), params["w_p"][:IN, :OUT],
                    preferred_element_type=jnp.float32)
        y = jnp.maximum(y + params["bias"], 0.0)
        y = y * params["scale"] + params["shift"]
        return y.astype(out_dtype)

    tn, tk, N, K = params["tn"], params["tk"], params["N"], params["K"]
    tm = params["d_tm"] if tm is None else tm
    tm = min(tm, _round_up(B, 16))     # bf16 packs 16 sublanes per vreg
    M = _round_up(B, tm)

    # Skinny-M megacore split: give the parallel N axis >= 2 blocks when the
    # M axis has only one, so both v7x TensorCores get work.
    if M // tm == 1 and N // tn == 1 and N >= 256:
        cand = (N // 2) // 128 * 128
        while cand >= 128 and N % cand != 0:
            cand -= 128
        if cand >= 128:
            tn = cand

    # x: cast to bf16; only copy-pad when not already tile-aligned.
    x_bf = x.astype(jnp.bfloat16)
    if (M, K) == (B, IN):
        x_p = x_bf
    else:
        x_p = jnp.zeros((M, K), jnp.bfloat16).at[:B, :IN].set(x_bf)

    grid = (M // tm, N // tn, K // tk)
    out_bytes = jnp.dtype(out_dtype).itemsize

    # Double-buffered inputs/outputs + resident f32 accumulator, 1.5x headroom,
    # capped per-chip (56 MiB on 64 MiB-VMEM chips, 100 MiB on 128 MiB chips).
    tile_vmem = (2 * (tm * tk * 2 + tk * tn * 2 + 3 * tn * 4
                      + tm * tn * out_bytes)
                 + tm * tn * 4)
    vmem_limit = int(min(params["vmem_limit_cap"],
                         max(32 * 1024 * 1024, tile_vmem + tile_vmem // 2)))

    # Realistic re-fetch accounting: x is read N/tn times, w M/tm times.
    cost = pl.CostEstimate(
        flops=2 * M * N * K,
        transcendentals=0,
        bytes_accessed=(M * K * 2 * (N // tn)
                        + K * N * 2 * (M // tm)
                        + 3 * N * 4 * (M // tm)
                        + M * N * out_bytes))

    out = pl.pallas_call(
        bn_linear_kernel,
        out_shape=jax.ShapeDtypeStruct((M, N), out_dtype),
        grid_spec=pltpu.PrefetchScalarGridSpec(
            num_scalar_prefetch=0,
            grid=grid,
            in_specs=[
                pl.BlockSpec((tm, tk), lambda i, j, k: (i, k)),
                pl.BlockSpec((tk, tn), lambda i, j, k: (k, j)),
                pl.BlockSpec((3, tn), lambda i, j, k: (0, j)),
            ],
            out_specs=pl.BlockSpec((tm, tn), lambda i, j, k: (i, j)),
            scratch_shapes=[pltpu.VMEM((tm, tn), jnp.float32)],
        ),
        compiler_params=pltpu.CompilerParams(
            dimension_semantics=("parallel", "parallel", "arbitrary"),
            vmem_limit_bytes=vmem_limit),
        cost_estimate=cost,
    )(x_p, params["w_p"], params["side"])

    return out[:B, :OUT]


def bn_linear(x, w_t, b, gamma, beta, running_mean, running_var,
              eps: float = 1e-5, **kwargs):
    """Convenience single-shot wrapper (prepare + apply)."""
    params = prepare_bn_linear(w_t, b, gamma, beta, running_mean, running_var,
                               eps=eps)
    return bn_linear_apply(params, x, **kwargs)


if __name__ == "__main__":
    # Small shapes consistent with the module: batch=8, in=32, out=64.
    B, IN, OUT = 8, 32, 64
    eps = 1e-5

    key = jax.random.PRNGKey(0)
    kx, kw, kb, kg, kbeta, km, kv = jax.random.split(key, 7)

    x = jax.random.normal(kx, (B, IN), dtype=jnp.float32)

    # PyTorch-shaped parameters (linear.weight is (OUT, IN); stored transposed).
    w = jax.random.normal(kw, (OUT, IN), dtype=jnp.float32) * (1.0 / jnp.sqrt(IN))
    w_t = w.T
    b = jax.random.normal(kb, (OUT,), dtype=jnp.float32) * 0.1
    gamma = 1.0 + 0.1 * jax.random.normal(kg, (OUT,), dtype=jnp.float32)
    beta = 0.1 * jax.random.normal(kbeta, (OUT,), dtype=jnp.float32)
    running_mean = 0.1 * jax.random.normal(km, (OUT,), dtype=jnp.float32)
    running_var = jnp.abs(
        1.0 + 0.1 * jax.random.normal(kv, (OUT,), dtype=jnp.float32))

    params = prepare_bn_linear(w_t, b, gamma, beta, running_mean, running_var,
                               eps=eps)

    # Force the Pallas path even at this tiny size (exercise the kernel).
    out = bn_linear_apply(params, x, force_pallas=True)
    jax.block_until_ready(out)

    # Also exercise the tiny-problem jnp fallback path.
    out_fb = bn_linear_apply(params, x)
    jax.block_until_ready(out_fb)

    # Pure-JAX reference (matching the kernel's bf16 matmul operands, f32 acc).
    xb = x.astype(jnp.bfloat16).astype(jnp.float32)
    wb = w_t.astype(jnp.bfloat16).astype(jnp.float32)
    ref = jnp.maximum(xb @ wb + b, 0.0)
    ref_scale = gamma / jnp.sqrt(running_var + eps)
    ref = ref * ref_scale + (beta - running_mean * ref_scale)

    assert out.shape == (B, OUT)
    assert jnp.allclose(out, ref, atol=1e-2, rtol=1e-2), "pallas mismatch"
    assert jnp.allclose(out_fb, ref, atol=1e-2, rtol=1e-2), "fallback mismatch"

    print("KERNEL_OK")
</pallas_src>

<mosaic_0001>
module attributes {stable_mosaic.version = 11 : i64} {
  func.func @bn_linear_kernel(%arg0: i32, %arg1: i32, %arg2: i32, %arg3: memref<16x128xbf16, #tpu.memory_space<vmem>>, %arg4: memref<128x128xbf16, #tpu.memory_space<vmem>>, %arg5: memref<3x128xf32, #tpu.memory_space<vmem>>, %arg6: memref<16x128xf32, #tpu.memory_space<vmem>>, %arg7: memref<16x128xf32, #tpu.memory_space<vmem>>) attributes {dimension_semantics = [#tpu.dimension_semantics<parallel>, #tpu.dimension_semantics<parallel>, #tpu.dimension_semantics<arbitrary>], iteration_bounds = array<i64: 1, 1, 1>, scalar_prefetch = 0 : i64, scratch_operands = 1 : i64, tpu.core_type = #tpu.core_type<tc>, window_params = [{transform_indices = @transform_0, window_bounds = array<i64: 16, 128>}, {transform_indices = @transform_1, window_bounds = array<i64: 128, 128>}, {transform_indices = @transform_2, window_bounds = array<i64: 3, 128>}, {transform_indices = @transform_3, window_bounds = array<i64: 16, 128>}]} {
    %c0 = arith.constant 0 : index
    %c0_0 = arith.constant 0 : index
    %0 = vector.load %arg3[%c0, %c0_0] : memref<16x128xbf16, #tpu.memory_space<vmem>>, vector<16x128xbf16>
    %c0_1 = arith.constant 0 : index
    %c0_2 = arith.constant 0 : index
    %1 = vector.load %arg4[%c0_1, %c0_2] : memref<128x128xbf16, #tpu.memory_space<vmem>>, vector<128x128xbf16>
    %cst = arith.constant dense<0.000000e+00> : vector<16x128xf32>
    %2 = tpu.matmul %0, %1, %cst {dimension_numbers = #tpu.dot_dimension_numbers<[1], [0], [0], [1], [0, 0, 1, 1], [], []>} : vector<16x128xbf16>, vector<128x128xbf16>, vector<16x128xf32> -> vector<16x128xf32>
    %c0_i32 = arith.constant 0 : i32
    %3 = arith.cmpi eq, %arg2, %c0_i32 : i32
    %4 = arith.extui %3 : i1 to i32
    %c0_i32_3 = arith.constant 0 : i32
    %5 = arith.cmpi ne, %4, %c0_i32_3 : i32
    scf.if %5 {
      %c0_8 = arith.constant 0 : index
      %c0_9 = arith.constant 0 : index
      %12 = vector.load %arg7[%c0_8, %c0_9] : memref<16x128xf32, #tpu.memory_space<vmem>>, vector<16x128xf32>
      tpu.vector_store %arg7[%c0_8, %c0_9], %2 {strides = array<i32>} : memref<16x128xf32, #tpu.memory_space<vmem>>, vector<16x128xf32>,
    } else {
    }
    %c0_i32_4 = arith.constant 0 : i32
    %6 = arith.cmpi sgt, %arg2, %c0_i32_4 : i32
    %7 = arith.extui %6 : i1 to i32
    %c0_i32_5 = arith.constant 0 : i32
    %8 = arith.cmpi ne, %7, %c0_i32_5 : i32
    scf.if %8 {
      %c0_8 = arith.constant 0 : index
      %c0_9 = arith.constant 0 : index
      %12 = vector.load %arg7[%c0_8, %c0_9] : memref<16x128xf32, #tpu.memory_space<vmem>>, vector<16x128xf32>
      %13 = arith.addf %12, %2 : vector<16x128xf32>
      %c0_10 = arith.constant 0 : index
      %c0_11 = arith.constant 0 : index
      %14 = vector.load %arg7[%c0_10, %c0_11] : memref<16x128xf32, #tpu.memory_space<vmem>>, vector<16x128xf32>
      tpu.vector_store %arg7[%c0_10, %c0_11], %13 {strides = array<i32>} : memref<16x128xf32, #tpu.memory_space<vmem>>, vector<16x128xf32>,
    } else {
    }
    %c0_i32_6 = arith.constant 0 : i32
    %9 = arith.cmpi eq, %arg2, %c0_i32_6 : i32
    %10 = arith.extui %9 : i1 to i32
    %c0_i32_7 = arith.constant 0 : i32
    %11 = arith.cmpi ne, %10, %c0_i32_7 : i32
    scf.if %11 {
      %c0_8 = arith.constant 0 : index
      %c0_9 = arith.constant 0 : index
      %12 = vector.load %arg5[%c0_8, %c0_9] : memref<3x128xf32, #tpu.memory_space<vmem>>, vector<1x128xf32>
      %c1 = arith.constant 1 : index
      %c0_10 = arith.constant 0 : index
      %13 = vector.load %arg5[%c1, %c0_10] : memref<3x128xf32, #tpu.memory_space<vmem>>, vector<1x128xf32>
      %c2 = arith.constant 2 : index
      %c0_11 = arith.constant 0 : index
      %14 = vector.load %arg5[%c2, %c0_11] : memref<3x128xf32, #tpu.memory_space<vmem>>, vector<1x128xf32>
      %c0_12 = arith.constant 0 : index
      %c0_13 = arith.constant 0 : index
      %15 = vector.load %arg7[%c0_12, %c0_13] : memref<16x128xf32, #tpu.memory_space<vmem>>, vector<16x128xf32>
      %16 = vector.broadcast %12 : vector<1x128xf32> to vector<16x128xf32>
      %17 = arith.addf %15, %16 : vector<16x128xf32>
      %cst_14 = arith.constant 0.000000e+00 : f32
      %18 = vector.broadcast %cst_14 : f32 to vector<16x128xf32>
      %19 = arith.maximumf %17, %18 : vector<16x128xf32>
      %20 = vector.broadcast %13 : vector<1x128xf32> to vector<16x128xf32>
      %21 = arith.mulf %19, %20 : vector<16x128xf32>
      %22 = vector.broadcast %14 : vector<1x128xf32> to vector<16x128xf32>
      %23 = arith.addf %21, %22 : vector<16x128xf32>
      %c0_15 = arith.constant 0 : index
      %c0_16 = arith.constant 0 : index
      %24 = vector.load %arg6[%c0_15, %c0_16] : memref<16x128xf32, #tpu.memory_space<vmem>>, vector<16x128xf32>
      tpu.vector_store %arg6[%c0_15, %c0_16], %23 {strides = array<i32>} : memref<16x128xf32, #tpu.memory_space<vmem>>, vector<16x128xf32>,
    } else {
    }
    return
  }
  func.func @transform_0(%arg0: i32, %arg1: i32, %arg2: i32) -> (i32, i32) {
    %c0_i32 = arith.constant 0 : i32
    return %arg0, %arg2 : i32, i32
  }
  func.func @transform_1(%arg0: i32, %arg1: i32, %arg2: i32) -> (i32, i32) {
    %c0_i32 = arith.constant 0 : i32
    return %arg2, %arg1 : i32, i32
  }
  func.func @transform_2(%arg0: i32, %arg1: i32, %arg2: i32) -> (i32, i32) {
    %c0_i32 = arith.constant 0 : i32
    %c0_i32_0 = arith.constant 0 : i32
    return %c0_i32, %arg1 : i32, i32
  }
  func.func @transform_3(%arg0: i32, %arg1: i32, %arg2: i32) -> (i32, i32) {
    %c0_i32 = arith.constant 0 : i32
    return %arg0, %arg1 : i32, i32
  }
}

</mosaic_0001>

<bundles_post_ra>
// kernel: tpu_custom_call.1
= control target key start
LH: loop header
LB: loop body
LE: loop exit
PB: predicated region body
PF: predicated region fallthrough
CT: control target
= control target key end

     0   :  { %8 = vsyncpa [#allocation4], 0  ;;  %s401_s0 = inlined_call_operand.hbm [shape: bf16[16,128], index: 0, kind: input, shape index: {}]   ;;  %s402_s1 = inlined_call_operand.hbm [shape: bf16[128,128], index: 1, kind: input, shape index: {}]   ;;  %s403_s2 = inlined_call_operand.hbm [shape: f32[3,128], index: 2, kind: input, shape index: {}]   ;;  %s404_s3 = inlined_call_operand.hbm [shape: f32[16,128], index: 3, kind: output, shape index: {}]  }
   0x1   :  { %9 = vsyncpa [#allocation7], 0 }
   0x2   :  { %10 = vsyncpa [#allocation5], 0  ;;  %s28_s14 = sshll.u32 %s402_s1, 4  ;;  %s361_s15 = smov [#allocation6]   ;;  %s29_s14 = int_to_ptr.hbm [resolvable:$true] %s28_s14 }
   0x3   :  { %s30_s16 = sshll.u32 %s361_s15, 4  ;;  %s15_s19 = sshll.u32 %s401_s0, 4  ;;  %s31_s16 = int_to_ptr.vmem [resolvable:$true] %s30_s16  ;;  %s16_s19 = int_to_ptr.hbm [resolvable:$true] %s15_s19 }
   0x4   :  { %s362_s20 = smov 64   ;;  %s363_s21 = smov 4  }
   0x5   :  { %36 = dma.hbm_to_vmem [thread:$0]  %s29_s14, 1024, %s31_s16, [#allocation7], %s362_s20, %s362_s20, %s363_s21  }
   0x6   :  { %s364_s22 = smov [#allocation3]   ;;  %s42_s26 = sshll.u32 %s403_s2, 4  ;;  %s43_s26 = int_to_ptr.hbm [resolvable:$true] %s42_s26 }
   0x7   :  { %s17_s23 = sshll.u32 %s364_s22, 4  ;;  %s365_s1 = smov [#allocation8]   ;;  %s18_s23 = int_to_ptr.vmem [resolvable:$true] %s17_s23 }
   0x8   :  { %23 = dma.hbm_to_vmem [thread:$0]  %s16_s19, 128, %s18_s23, [#allocation4], %s362_s20, %s362_s20, %s363_s21  }
   0x9   :  { %s44_s27 = sshll.u32 %s365_s1, 4  ;;  %s45_s27 = int_to_ptr.vmem [resolvable:$true] %s44_s27 }
   0xa   :  { %47 = dma.hbm_to_vmem [thread:$0]  %s43_s26, 64, %s45_s27, [#allocation7]  }
   0xb   :  { %355 = dma.done.wait [#allocation4], 128  }
   0xc   :  { %356 = vsyncadd [#allocation4], 4294967168 }
   0xd   :  { %357 = dma.done.wait [#allocation7], 1088  }
   0xe   :  { %358 = vsyncadd [#allocation7], 4294966208  ;;  %v247_v0 = vld [vmem:[#allocation6 + $0x38] sm:$0xff]  ;;  %v246_v1 = vld [vmem:[#allocation6 + $0x30] sm:$0xff]  ;;  %s366_s0 = smov [#allocation9]   ;;  %s189_s30 = sshll.u32 %s404_s3, 4  ;;  %s190_s30 = int_to_ptr.hbm [resolvable:$true] %s189_s30 }
   0xf   :  { %132 = vmatpush.bf16.msra.mxu0 %v247_v0  ;;  %v245_v2 = vld [vmem:[#allocation6 + $0x28] sm:$0xff]  ;;  %v244_v3 = vld [vmem:[#allocation6 + $0x20] sm:$0xff]  ;;  %v243_v4 = vld [vmem:[#allocation6 + $0x18] sm:$0xff]  ;;  %s187_s2 = sshll.u32 %s366_s0, 4  ;;  %s367_s4 = smov 128   ;;  %s188_s2 = int_to_ptr.vmem [resolvable:$true] %s187_s2 }
  0x10   :  { %v242_v5 = vld [vmem:[#allocation6 + $0x10] sm:$0xff]  ;;  %v241_v6 = vld [vmem:[#allocation6 + $0x8] sm:$0xff]  ;;  %v240_v7 = vld [vmem:[#allocation6] sm:$0xff]  ;;  %s368_s5 = smov 8  }
  0x11   :  { %v239_v8 = vld [vmem:[#allocation3] sm:$0xff]  ;;  %v256_v9 = vld [vmem:[#allocation8] ss:$0 sm:$0xff]  ;;  %v257_v12 = vld [vmem:[#allocation8 + $0x1] ss:$0 sm:$0xff] }
  0x12   :  { %v258_v14 = vld [vmem:[#allocation8 + $0x2] ss:$0 sm:$0xff] }
  0x13   :  { %133 = vmatpush.bf16.msra.mxu0 %v246_v1 }
  0x17   :  { %134 = vmatpush.bf16.msra.mxu0 %v245_v2 }
  0x1b   :  { %135 = vmatpush.bf16.msra.mxu0 %v244_v3 }
  0x1f   :  { %136 = vmatpush.bf16.msra.mxu0 %v243_v4 }
  0x23   :  { %137 = vmatpush.bf16.msra.mxu0 %v242_v5 }
  0x27   :  { %138 = vmatpush.bf16.msra.mxu0 %v241_v6 }
  0x2b   :  { %139 = vmatpush.bf16.msra.mxu0 %v240_v7 }
  0x2e   :  { %140 = vmatmul.bf16.vlgmr.msra.gmra.mxu0 %v239_v8 }
  0xab   :  { %v141_v10 = vpop.f32.mrf.mxu0 }
  0xac   :  { %v171_v11 = vadd.f32 %v256_v9, %v141_v10 }
  0xae   :  { %v173_v13 = vmax.f32 %v171_v11, 0.0 }
  0xb0   :  { %v176_v15 = vmul.f32 %v257_v12, %v173_v13 }
  0xb2   :  { %v179_v16 = vadd.f32 %v258_v14, %v176_v15 }
  0xb3   :  { %v143_v17 = vpop.f32.mrf.mxu0 }
  0xb4   :  { %181 = vst [vmem:[#allocation9] sm:$0xff] %v179_v16  ;;  %v172_v18 = vadd.f32 %v256_v9, %v143_v17 }
  0xb6   :  { %v174_v19 = vmax.f32 %v172_v18, 0.0 }
  0xb8   :  { %v177_v20 = vmul.f32 %v257_v12, %v174_v19 }
  0xba   :  { %v180_v21 = vadd.f32 %v258_v14, %v177_v20 }
  0xbc   :  { %182 = vst [vmem:[#allocation9 + $0x8] sm:$0xff] %v180_v21 }
  0xbd   :  { %195 = dma.vmem_to_hbm [thread:$0]  %s188_s2, 256, %s190_s30, [#allocation5], %s367_s4, %s367_s4, %s368_s5  }
  0xbe   :  { %359 = dma.done.wait [#allocation5], 256  }
  0xbf   :  { %360 = vsyncadd [#allocation5], 4294967040 }
  0xc0   :  { %200 = vsyncpa [#allocation4], 1 }
  0xc1   :  { %201 = vsyncpa [#allocation7], 1 }
  0xc2   :  { %202 = vsyncpa [#allocation5], 1 }

</bundles_post_ra>
